<compile_context>
chip_gen: v7x
topology: tpu7x:2x2x1
jax: 0.10.0
libtpu: 0.0.40
codegen_flags: <defaults>
</compile_context>

<pallas_src>
import jax
import jax.numpy as jnp
from jax.experimental import pallas as pl
from jax.experimental.pallas import tpu as pltpu


def _cdiv(a, b):
    return -(-a // b)


def discriminator_kernel(xT_ref, w1_ref, b1_ref, w2_ref, b2_ref, o_ref):
    # fc1 in feature-major orientation: hT = W1 @ xT  -> (H, TB) on the MXU,
    # f32 accumulation regardless of input dtype.
    hT = jnp.dot(w1_ref[...], xT_ref[...], preferred_element_type=jnp.float32)
    hT = jnp.maximum(hT + b1_ref[...], 0.0)            # (H, TB); (H,1) bias bcast over lanes

    # fc2 with output width 1: a 1-row/1-col MXU matmul would waste the MXU,
    # so do a sublane-broadcast multiply + cross-sublane (XLU) reduction.
    # All post-matmul elementwise math stays in f32 (v5e has no bf16 VPU/EUP).
    logits = jnp.sum(hT * w2_ref[...], axis=0, keepdims=True) + b2_ref[0, 0]  # (1, TB)

    # F.softmax over a singleton class axis is 1.0 for finite logits and NaN
    # for non-finite ones.  Use an explicit finite-check select (robust
    # against the compiler folding exp(x - x) -> 1).
    finite = jnp.abs(logits) < jnp.inf                  # False for NaN and +-inf
    o_ref[...] = jnp.where(finite,
                           jnp.ones_like(logits),
                           jnp.full_like(logits, jnp.nan))


def discriminator_forward(x, a, w1, b1, w2, b2, *, max_block_b=8192, use_bf16=True):
    """Forward pass of the GAIL Discriminator.

    x:  (B, state_size)         a: (B, action_size)  -- unused, as in PyTorch
    w1: (hidden, state_size)    b1: (hidden,)         -- fc1 (PyTorch layout)
    w2: (1, hidden)             b2: (1,)              -- fc2 (PyTorch layout)
    returns (B, 1) float32
    """
    del a  # unused by the PyTorch module's forward
    B, S = x.shape
    H = w1.shape[0]

    LANE = 128
    x_dtype = jnp.bfloat16 if use_bf16 else jnp.float32

    # Feature-major / lane-dense presentation of x: (S, B).  In production the
    # producer should emit this layout directly; here it is wrapper plumbing.
    xT = jnp.asarray(x, x_dtype).T                      # (S, B)
    w1c = jnp.asarray(w1, x_dtype)                      # (H, S)
    b1_col = jnp.asarray(b1, jnp.float32).reshape(H, 1)
    w2_col = jnp.asarray(w2, jnp.float32).reshape(H, 1)
    b2_smem = jnp.asarray(b2, jnp.float32).reshape(1, 1)

    # ---- batch-tile sizing from a VMEM budget (safe on v5e/v6e/v7x) --------
    # Per batch column: x tile double-buffered, (H, TB) f32 intermediate,
    # (1, TB) output double-buffered with sublane padding to 8 rows.
    x_bytes = 2 if use_bf16 else 4
    per_col = 2 * S * x_bytes + H * 4 + 2 * 8 * 4
    vmem_budget = 24 * 1024 * 1024                      # leave headroom under 32 MiB scoped
    tb_cap = max(LANE, (vmem_budget // per_col) // LANE * LANE)
    tb_cap = min(tb_cap, max(LANE, (max_block_b // LANE) * LANE))

    # Clamp padding overshoot: fix the tile count first, then take the
    # smallest lane-multiple TB that covers B with that many tiles.
    n_tiles = _cdiv(B, tb_cap)
    TB = _cdiv(_cdiv(B, n_tiles), LANE) * LANE
    B_pad = n_tiles * TB
    if B_pad != B:
        xT = jnp.pad(xT, ((0, 0), (0, B_pad - B)))

    out_t = pl.pallas_call(
        discriminator_kernel,
        out_shape=jax.ShapeDtypeStruct((1, B_pad), jnp.float32),
        grid=(n_tiles,),
        in_specs=[
            pl.BlockSpec((S, TB), lambda i: (0, i)),    # xT: batch tiled along lanes
            pl.BlockSpec((H, S), lambda i: (0, 0)),     # w1: replicated per tile
            pl.BlockSpec((H, 1), lambda i: (0, 0)),     # b1 column: replicated
            pl.BlockSpec((H, 1), lambda i: (0, 0)),     # w2 column: replicated
            pl.BlockSpec(memory_space=pltpu.MemorySpace.SMEM),  # b2 scalar
        ],
        out_specs=pl.BlockSpec((1, TB), lambda i: (0, i)),      # lane-dense output slab
        compiler_params=pltpu.CompilerParams(
            # "parallel" shards batch tiles across v7x's 2 TCs; ~no-op on v5e/v6e.
            dimension_semantics=("parallel",),
            vmem_limit_bytes=32 * 1024 * 1024,
        ),
        # If a profile on v6e still shows exposed x DMA after enlarging TB,
        # add pipeline_mode=pl.Buffered(3) on the xT BlockSpec.
    )(xT, w1c, b1_col, w2_col, b2_smem)

    return out_t[0, :B].reshape(B, 1)


def init_params(key, state_size, hidden_size):
    # Deterministic init mimicking nn.Linear defaults (uniform +-1/sqrt(fan_in)),
    # in PyTorch parameter layouts: w1 (H, S), b1 (H,), w2 (1, H), b2 (1,).
    k1, k2, k3, k4 = jax.random.split(key, 4)
    lim1 = 1.0 / jnp.sqrt(jnp.float32(state_size))
    lim2 = 1.0 / jnp.sqrt(jnp.float32(hidden_size))
    w1 = jax.random.uniform(k1, (hidden_size, state_size), jnp.float32, -lim1, lim1)
    b1 = jax.random.uniform(k2, (hidden_size,), jnp.float32, -lim1, lim1)
    w2 = jax.random.uniform(k3, (1, hidden_size), jnp.float32, -lim2, lim2)
    b2 = jax.random.uniform(k4, (1,), jnp.float32, -lim2, lim2)
    return w1, b1, w2, b2


if __name__ == "__main__":
    batch, state_size, hidden_size, action_size = 8, 16, 32, 4

    key = jax.random.PRNGKey(0)
    kx, ka, kp = jax.random.split(key, 3)
    x = jax.random.normal(kx, (batch, state_size), jnp.float32)
    a = jax.random.normal(ka, (batch, action_size), jnp.float32)  # unused, as in PyTorch
    w1, b1, w2, b2 = init_params(kp, state_size, hidden_size)

    out = discriminator_forward(x, a, w1, b1, w2, b2)
    out = jax.block_until_ready(out)

    # Pure-JAX reference of the same semantics (softmax over singleton axis).
    h_ref = jnp.maximum(x @ w1.T + b1, 0.0)
    logits_ref = h_ref @ w2.T + b2                    # (B, 1)
    ref = jax.nn.softmax(logits_ref, axis=-1)         # singleton axis -> all ones
    assert out.shape == (batch, 1), out.shape
    assert bool(jnp.all(jnp.isfinite(out))), out
    assert jnp.allclose(out, ref, atol=1e-6), (out, ref)

    print("KERNEL_OK")
</pallas_src>

<mosaic_0001>
module attributes {stable_mosaic.version = 11 : i64} {
  func.func @discriminator_kernel(%arg0: i32, %arg1: memref<16x128xbf16, #tpu.memory_space<vmem>>, %arg2: memref<32x16xbf16, #tpu.memory_space<vmem>>, %arg3: memref<32x1xf32, #tpu.memory_space<vmem>>, %arg4: memref<32x1xf32, #tpu.memory_space<vmem>>, %arg5: memref<1x1xf32, #tpu.memory_space<smem>>, %arg6: memref<1x128xf32, #tpu.memory_space<vmem>>) attributes {dimension_semantics = [#tpu.dimension_semantics<parallel>], iteration_bounds = array<i64: 1>, scalar_prefetch = 0 : i64, scratch_operands = 0 : i64, tpu.core_type = #tpu.core_type<tc>, window_params = [{transform_indices = @transform_0, window_bounds = array<i64: 16, 128>}, {pipeline_mode = #tpu.pipeline_mode<synchronous>, transform_indices = @transform_1, window_bounds = array<i64: 32, 16>}, {pipeline_mode = #tpu.pipeline_mode<synchronous>, transform_indices = @transform_2, window_bounds = array<i64: 32, 1>}, {pipeline_mode = #tpu.pipeline_mode<synchronous>, transform_indices = @transform_3, window_bounds = array<i64: 32, 1>}, {transform_indices = @transform_4, window_bounds = array<i64: 1, 1>}, {transform_indices = @transform_5, window_bounds = array<i64: 1, 128>}]} {
    %c0 = arith.constant 0 : index
    %c0_0 = arith.constant 0 : index
    %0 = vector.load %arg2[%c0, %c0_0] : memref<32x16xbf16, #tpu.memory_space<vmem>>, vector<32x16xbf16>
    %c0_1 = arith.constant 0 : index
    %c0_2 = arith.constant 0 : index
    %1 = vector.load %arg1[%c0_1, %c0_2] : memref<16x128xbf16, #tpu.memory_space<vmem>>, vector<16x128xbf16>
    %cst = arith.constant dense<0.000000e+00> : vector<32x128xf32>
    %2 = tpu.matmul %0, %1, %cst {dimension_numbers = #tpu.dot_dimension_numbers<[1], [0], [0], [1], [0, 0, 1, 1], [], []>} : vector<32x16xbf16>, vector<16x128xbf16>, vector<32x128xf32> -> vector<32x128xf32>
    %c0_3 = arith.constant 0 : index
    %c0_4 = arith.constant 0 : index
    %3 = vector.load %arg3[%c0_3, %c0_4] : memref<32x1xf32, #tpu.memory_space<vmem>>, vector<32x1xf32>
    %4 = vector.broadcast %3 : vector<32x1xf32> to vector<32x128xf32>
    %5 = arith.addf %2, %4 : vector<32x128xf32>
    %cst_5 = arith.constant 0.000000e+00 : f32
    %6 = vector.broadcast %cst_5 : f32 to vector<32x128xf32>
    %7 = arith.maximumf %5, %6 : vector<32x128xf32>
    %c0_6 = arith.constant 0 : index
    %c0_7 = arith.constant 0 : index
    %8 = vector.load %arg4[%c0_6, %c0_7] : memref<32x1xf32, #tpu.memory_space<vmem>>, vector<32x1xf32>
    %9 = vector.broadcast %8 : vector<32x1xf32> to vector<32x128xf32>
    %10 = arith.mulf %7, %9 : vector<32x128xf32>
    %cst_8 = arith.constant dense<0.000000e+00> : vector<128xf32>
    %11 = vector.multi_reduction <add>, %10, %cst_8 [0] : vector<32x128xf32> to vector<128xf32>
    %12 = vector.shape_cast %11 : vector<128xf32> to vector<1x128xf32>
    %c0_9 = arith.constant 0 : index
    %c0_10 = arith.constant 0 : index
    %13 = memref.load %arg5[%c0_9, %c0_10] : memref<1x1xf32, #tpu.memory_space<smem>>
    %14 = vector.broadcast %13 : f32 to vector<1x128xf32>
    %15 = arith.addf %12, %14 : vector<1x128xf32>
    %16 = math.absf %15 : vector<1x128xf32>
    %cst_11 = arith.constant 0x7F800000 : f32
    %17 = vector.broadcast %cst_11 : f32 to vector<1x128xf32>
    %18 = arith.cmpf olt, %16, %17 : vector<1x128xf32>
    %cst_12 = arith.constant 1.000000e+00 : f32
    %19 = vector.broadcast %cst_12 : f32 to vector<1x128xf32>
    %cst_13 = arith.constant 0x7FC00000 : f32
    %20 = vector.broadcast %cst_13 : f32 to vector<1x128xf32>
    %21 = arith.select %18, %19, %20 : vector<1x128xi1>, vector<1x128xf32>
    %c0_14 = arith.constant 0 : index
    %c0_15 = arith.constant 0 : index
    %22 = vector.load %arg6[%c0_14, %c0_15] : memref<1x128xf32, #tpu.memory_space<vmem>>, vector<1x128xf32>
    tpu.vector_store %arg6[%c0_14, %c0_15], %21 {strides = array<i32>} : memref<1x128xf32, #tpu.memory_space<vmem>>, vector<1x128xf32>,
    return
  }
  func.func @transform_0(%arg0: i32) -> (i32, i32) {
    %c0_i32 = arith.constant 0 : i32
    %c0_i32_0 = arith.constant 0 : i32
    return %c0_i32, %arg0 : i32, i32
  }
  func.func @transform_1(%arg0: i32) -> (i32, i32) {
    %c0_i32 = arith.constant 0 : i32
    %c0_i32_0 = arith.constant 0 : i32
    %c0_i32_1 = arith.constant 0 : i32
    return %c0_i32, %c0_i32_0 : i32, i32
  }
  func.func @transform_2(%arg0: i32) -> (i32, i32) {
    %c0_i32 = arith.constant 0 : i32
    %c0_i32_0 = arith.constant 0 : i32
    %c0_i32_1 = arith.constant 0 : i32
    return %c0_i32, %c0_i32_0 : i32, i32
  }
  func.func @transform_3(%arg0: i32) -> (i32, i32) {
    %c0_i32 = arith.constant 0 : i32
    %c0_i32_0 = arith.constant 0 : i32
    %c0_i32_1 = arith.constant 0 : i32
    return %c0_i32, %c0_i32_0 : i32, i32
  }
  func.func @transform_4(%arg0: i32) -> (i32, i32) {
    %c0_i32 = arith.constant 0 : i32
    %c0_i32_0 = arith.constant 0 : i32
    %c0_i32_1 = arith.constant 0 : i32
    return %c0_i32, %c0_i32_0 : i32, i32
  }
  func.func @transform_5(%arg0: i32) -> (i32, i32) {
    %c0_i32 = arith.constant 0 : i32
    %c0_i32_0 = arith.constant 0 : i32
    return %c0_i32, %arg0 : i32, i32
  }
}

</mosaic_0001>

<bundles_post_ra>
// kernel: tpu_custom_call.1
= control target key start
LH: loop header
LB: loop body
LE: loop exit
PB: predicated region body
PF: predicated region fallthrough
CT: control target
= control target key end

     0   :  { %vm69_vm0 = vcmask 130048   ;;  %v233_v3 = vmov 0   ;;  %s314_s0 = inlined_call_operand.vmem [shape: bf16[16,128], index: 0, kind: input, shape index: {}]   ;;  %s315_s1 = inlined_call_operand.vmem [shape: bf16[32,16], index: 1, kind: input, shape index: {}]   ;;  %s316_s2 = inlined_call_operand.vmem [shape: f32[32,1], index: 2, kind: input, shape index: {}]   ;;  %s317_s3 = inlined_call_operand.vmem [shape: f32[32,1], index: 3, kind: input, shape index: {}]   ;;  %s318_s4 = inlined_call_operand.<no memory space> [shape: f32[1,1], index: 4, kind: input, shape index: {}]   ;;  %s319_s5 = inlined_call_operand.hbm [shape: f32[1,128], index: 5, kind: output, shape index: {}]  }
   0x1   :  { %v206_v0 = vld [vmem:[%s314_s0] sm:$0xff]   ;;  %v208_v2 = vld [vmem:[%s315_s1 + $0x8] sm:$0xff]   ;;  %204 = vset.pattern.permute.xlu0 %v233_v3  ;;  %v31_v5 = vld [vmem:[%s316_s2 + $0x10] sm:$0xff]  ;;  %205 = vset.pattern.permute.xlu1 %v233_v3 }
   0x2   :  { %v207_v1 = vld [vmem:[%s315_s1] sm:$0xff]   ;;  %195 = vmatprep.subr.bf16.mxu0 %v206_v0  ;;  %45 = vperm.xlu1 %205, %v31_v5   ;;  %v30_v6 = vld [vmem:[%s316_s2 + $0x8] sm:$0xff] }
   0x3   :  { %196 = vmatpush3.bf16.msra.mxu0 %v206_v0  ;;  %197 = vmatprep.mubr.msk.bf16.mxu0 %vm69_vm0, %v207_v1  ;;  %v29_v4 = vld [vmem:[%s316_s2] sm:$0xff] }
   0x4   :  { %35 = vperm.xlu0 %204, %v29_v4  }
   0x5   :  { %11 = vsyncpa [#allocation4], 0  ;;  %v32_v7 = vld [vmem:[%s316_s2 + $0x18] sm:$0xff]  ;;  %v129_v8 = vld [vmem:[%s317_s3] sm:$0xff]  ;;  %v167_v44 = vstv %s318_s4  ;;  %s234_s13 = smov [#allocation3]   ;;  %v235_v48 = vmov nan  }
   0x6   :  { %198 = vmatmul.mubr.msk.bf16.vlgmr.msra.gmra.mrb[0].mxu0 %vm69_vm0, %v208_v2  ;;  %50 = vperm.xlu1 %205, %v32_v7   ;;  %v130_v9 = vld [vmem:[%s317_s3 + $0x8] sm:$0xff]  ;;  %v131_v10 = vld [vmem:[%s317_s3 + $0x10] sm:$0xff]  ;;  %v132_v11 = vld [vmem:[%s317_s3 + $0x18] sm:$0xff]  ;;  %s179_s14 = sshll.u32 %s234_s13, 4  ;;  %s180_s14 = int_to_ptr.vmem [resolvable:$true] %s179_s14 }
   0x7   :  { %s209_s15 = scalar_lea.vmem %s180_s14, 16  ;;  %s213_s16 = scalar_lea.vmem %s180_s14, 32 }
   0x8   :  { %40 = vperm.xlu0 %204, %v30_v6   ;;  %p210_p0 = scmp.ne.s32.totalorder %s180_s14, %s209_s15  ;;  %p214_p1 = scmp.lt.s32.totalorder %s180_s14, %s180_s14 }
   0x9   :  { %p215_p2 = scmp.lt.s32.totalorder %s213_s16, %s209_s15 }
   0xa   :  { %140 = vperm.xlu1 %205, %v130_v9  }
   0xb   :  { %p216_p3 = por %p215_p2, %p214_p1 }
   0xc   :  { %135 = vperm.xlu0 %204, %v129_v8  }
   0xd   :  { %p217_p4 = pnand %p216_p3, %p210_p0 }
   0xe   :  { %150 = vperm.xlu1 %205, %v132_v11  }
  0x10   :  { %145 = vperm.xlu0 %204, %v131_v10  }
  0x81   :  { %v46_v13 = vpop.permute.xlu1 %45 }
  0x83   :  { %v36_v12 = vpop.permute.xlu0 %35 }
  0x85   :  { %v51_v15 = vpop.permute.xlu1 %50 }
  0x87   :  { %v41_v14 = vpop.permute.xlu0 %40 }
  0x89   :  { %v141_v26 = vpop.permute.xlu1 %140 }
  0x8b   :  { %v136_v21 = vpop.permute.xlu0 %135 }
  0x8d   :  { %v151_v35 = vpop.permute.xlu1 %150 }
  0x8f   :  { %v146_v32 = vpop.permute.xlu0 %145 }
  0xd9   :  { %v199_v16 = vpop.f32.mrb[0].mxu0 }
  0xda   :  { %v110_v17 = vpop.f32.mrb[1].mxu0  ;;  %v119_v18 = vadd.f32 %v199_v16, %v46_v13 }
  0xdb   :  { %v111_v19 = vadd.f32 %v110_v17, %v36_v12  ;;  %v200_v20 = vpop.f32.mrb[2].mxu0 }
  0xdc   :  { %v113_v22 = vpop.f32.mrb[3].mxu0  ;;  %v122_v24 = vadd.f32 %v200_v20, %v51_v15  ;;  %v127_v27 = vmax.f32 %v119_v18, 0.0 }
  0xdd   :  { %v125_v23 = vmax.f32 %v111_v19, 0.0  ;;  %v114_v25 = vadd.f32 %v113_v22, %v41_v14 }
  0xde   :  { %v128_v30 = vmax.f32 %v122_v24, 0.0  ;;  %v155_v33 = vmul.f32 %v146_v32, %v127_v27 }
  0xdf   :  { %v126_v28 = vmax.f32 %v114_v25, 0.0  ;;  %v153_v29 = vmul.f32 %v136_v21, %v125_v23 }
  0xe0   :  { %v156_v36 = vmul.f32 %v151_v35, %v128_v30 }
  0xe1   :  { %v154_v31 = vmul.f32 %v141_v26, %v126_v28 }
  0xe3   :  { %v157_v34 = vadd.f32 %v154_v31, %v153_v29 }
  0xe5   :  { %v158_v37 = vadd.f32 %v157_v34, %v155_v33 }
  0xe7   :  { %v159_v38 = vadd.f32 %v158_v37, %v156_v36 }
  0xe9   :  { %v160_v39 = vrot.slane %v159_v38, 4 }
  0xeb   :  { %v161_v40 = vadd.f32 %v160_v39, %v159_v38 }
  0xed   :  { %v162_v41 = vrot.slane %v161_v40, 2 }
  0xef   :  { %v163_v42 = vadd.f32 %v162_v41, %v161_v40 }
  0xf1   :  { %v164_v43 = vrot.slane %v163_v42, 1 }
  0xf3   :  { %v165_v45 = vadd.f32 %v164_v43, %v163_v42 }
  0xf5   :  { %v168_v46 = vadd.f32 %v167_v44, %v165_v45 }
  0xf7   :  { %v169_v47 = vand.u32 2147483647, %v168_v46 }
  0xf9   :  { %vm170_vm1 = vcmp.lt.f32.partialorder %v169_v47, inf }
  0xfa   :  { %v171_v49 = vsel %vm170_vm1, 1.0, %v235_v48 }
  0xfb   :  { %172 = vst [vmem:[#allocation3] sm:$0x1] %v171_v49 }
  0xfc   :  { %220 = shalt.err (!%p217_p4)
}
  0xfd   :  { %s221_s18 = scalar_lea.hbm %s319_s5, 16 }
  0xfe   :  { %p222_p5 = scmp.ne.s32.totalorder %s319_s5, %s221_s18  ;;  %p225_p6 = scmp.lt.u32.totalorder %s221_s18, %s319_s5 }
 0x100   :  { %p227_p7 = pnand %p225_p6, %p222_p5 }
 0x102   :  { %230 = shalt.err (!%p227_p7)
}
 0x103   :  { %182 = dma.vmem_to_hbm [thread:$0]  %s180_s14, 16, %s319_s5, [#allocation4]  }
 0x104   :  { %231 = dma.done.wait [#allocation4], 16  }
 0x105   :  { %232 = vsyncadd [#allocation4], 4294967280 }
 0x106   :  { %186 = vsyncpa [#allocation4], 1 }

</bundles_post_ra>
